<compile_context>
chip_gen: v5e
topology: v5e:2x2
jax: 0.10.0
libtpu: 0.0.40
codegen_flags: <defaults>
</compile_context>

<pallas_src>
import jax
import jax.numpy as jnp
from jax.experimental import pallas as pl
from jax.experimental.pallas import tpu as pltpu


def _conv_relu_kernel(p_ref, w_ref, b_ref, o_ref):
    # p_ref: (bn, K, S)   im2col patches for this batch block (S = OH*OW, lane dim)
    # w_ref: (Cout, K)    pre-flattened weights, K ordered (kh, kw, cin)
    # b_ref: (Cout, 1)
    # o_ref: (bn, Cout, S)  lane-dense output
    bn = p_ref.shape[0]
    w = w_ref[...]
    b = b_ref[...]
    for i in range(bn):  # bn is static & small; one clean 2-D MXU matmul each
        acc = jnp.dot(w, p_ref[i], preferred_element_type=jnp.float32)  # (Cout, S)
        o_ref[i] = jnp.maximum(acc + b, 0.0).astype(o_ref.dtype)


def _tensorcores_per_chip():
    # v7x has 2 TensorCores per chip; v5e / v6e have 1.  Best-effort detection.
    try:
        kind = jax.devices()[0].device_kind.lower()
    except Exception:
        return 1
    return 2 if "v7" in kind else 1


def _num_batch_blocks(n_batch):
    # Single grid step on single-TC chips (avoid per-step overhead); two
    # parallel blocks on v7x so both cores get work.
    if _tensorcores_per_chip() >= 2 and n_batch >= 2 and n_batch % 2 == 0:
        return 2
    return 1


def conv_relu(x_nchw, w_oihw, bias, stride, padding):
    """PyTorch-semantics ConvReLU: NCHW in, NCHW out (no layout transposes)."""
    N, Cin, H, W = x_nchw.shape
    Cout, _, KH, KW = w_oihw.shape

    xp = jnp.pad(x_nchw, ((0, 0), (0, 0), (padding, padding), (padding, padding)))
    Hp, Wp = H + 2 * padding, W + 2 * padding
    OH = (Hp - KH) // stride + 1
    OW = (Wp - KW) // stride + 1
    S = OH * OW
    K = KH * KW * Cin

    # --- im2col in the wrapper (plain XLA, lane-dense result) ----------------
    # patches[n, (kh*KW + kw)*Cin + cin, oh*OW + ow] = xp[n, cin, oh*s + kh, ow*s + kw]
    taps = []
    for kh in range(KH):
        for kw in range(KW):
            sl = jax.lax.slice(
                xp,
                (0, 0, kh, kw),
                (N, Cin, kh + (OH - 1) * stride + 1, kw + (OW - 1) * stride + 1),
                (1, 1, stride, stride),
            )  # (N, Cin, OH, OW)
            taps.append(sl.reshape(N, Cin, S))
    patches = jnp.concatenate(taps, axis=1)  # (N, K, S)

    # Flatten weights to (Cout, K), K ordered (kh, kw, cin) to match patches.
    w2d = jnp.transpose(w_oihw, (0, 2, 3, 1)).reshape(Cout, K)
    b2 = bias.reshape(Cout, 1)

    nb = _num_batch_blocks(N)
    bn = N // nb

    flops = 2 * N * S * Cout * K
    bytes_accessed = 4 * (patches.size + w2d.size + b2.size + N * Cout * S)

    out_flat = pl.pallas_call(
        _conv_relu_kernel,
        out_shape=jax.ShapeDtypeStruct((N, Cout, S), x_nchw.dtype),
        grid_spec=pltpu.PrefetchScalarGridSpec(
            num_scalar_prefetch=0,
            grid=(nb,),
            in_specs=[
                pl.BlockSpec((bn, K, S), lambda i: (i, 0, 0)),
                pl.BlockSpec((Cout, K), lambda i: (0, 0)),
                pl.BlockSpec((Cout, 1), lambda i: (0, 0)),
            ],
            out_specs=pl.BlockSpec((bn, Cout, S), lambda i: (i, 0, 0)),
        ),
        compiler_params=pltpu.CompilerParams(dimension_semantics=("parallel",)),
        cost_estimate=pl.CostEstimate(
            flops=flops, transcendentals=0, bytes_accessed=bytes_accessed
        ),
    )(patches, w2d, b2)

    # Pure trailing-dim reshape (free, no transpose): already NCHW.
    return out_flat.reshape(N, Cout, OH, OW)


if __name__ == "__main__":
    # ConvReLU(in_dim=4, out_dim=8, kernel_size=3, stride=1, padding=1)
    N, Cin, H, W = 2, 4, 16, 16
    Cout, Ksz, stride, pad = 8, 3, 1, 1

    key = jax.random.PRNGKey(0)
    kx, kw, kb = jax.random.split(key, 3)

    x = jax.random.normal(kx, (N, Cin, H, W), jnp.float32)

    # Deterministic init matching nn.Conv2d's default U(-1/sqrt(fan_in), +1/sqrt(fan_in))
    fan_in = Cin * Ksz * Ksz
    bound = 1.0 / (fan_in ** 0.5)
    w = jax.random.uniform(kw, (Cout, Cin, Ksz, Ksz), jnp.float32, -bound, bound)
    b = jax.random.uniform(kb, (Cout,), jnp.float32, -bound, bound)

    out = conv_relu(x, w, b, stride, pad)
    out = jax.block_until_ready(out)

    # Pure-JAX reference (same semantics as PyTorch Conv2d + ReLU)
    ref = jax.lax.conv_general_dilated(
        x, w, (stride, stride), [(pad, pad), (pad, pad)],
        dimension_numbers=("NCHW", "OIHW", "NCHW"),
    )
    ref = jnp.maximum(ref + b[None, :, None, None], 0.0)

    OH = (H + 2 * pad - Ksz) // stride + 1
    OW = (W + 2 * pad - Ksz) // stride + 1
    assert out.shape == (N, Cout, OH, OW), out.shape
    assert jnp.allclose(out, ref, atol=1e-4, rtol=1e-4), float(
        jnp.max(jnp.abs(out - ref))
    )
    print("KERNEL_OK")
</pallas_src>

<mosaic_0001>
module attributes {stable_mosaic.version = 11 : i64} {
  func.func @_conv_relu_kernel(%arg0: i32, %arg1: memref<2x36x256xf32, #tpu.memory_space<vmem>>, %arg2: memref<8x36xf32, #tpu.memory_space<vmem>>, %arg3: memref<8x1xf32, #tpu.memory_space<vmem>>, %arg4: memref<2x8x256xf32, #tpu.memory_space<vmem>>) attributes {dimension_semantics = [#tpu.dimension_semantics<parallel>], iteration_bounds = array<i64: 1>, scalar_prefetch = 0 : i64, scratch_operands = 0 : i64, tpu.core_type = #tpu.core_type<tc>, window_params = [{transform_indices = @transform_0, window_bounds = array<i64: 2, 36, 256>}, {pipeline_mode = #tpu.pipeline_mode<synchronous>, transform_indices = @transform_1, window_bounds = array<i64: 8, 36>}, {pipeline_mode = #tpu.pipeline_mode<synchronous>, transform_indices = @transform_2, window_bounds = array<i64: 8, 1>}, {transform_indices = @transform_3, window_bounds = array<i64: 2, 8, 256>}]} {
    %c0 = arith.constant 0 : index
    %c0_0 = arith.constant 0 : index
    %0 = vector.load %arg2[%c0, %c0_0] : memref<8x36xf32, #tpu.memory_space<vmem>>, vector<8x36xf32>
    %c0_1 = arith.constant 0 : index
    %c0_2 = arith.constant 0 : index
    %1 = vector.load %arg3[%c0_1, %c0_2] : memref<8x1xf32, #tpu.memory_space<vmem>>, vector<8x1xf32>
    %c0_3 = arith.constant 0 : index
    %c0_4 = arith.constant 0 : index
    %c0_5 = arith.constant 0 : index
    %2 = vector.load %arg1[%c0_3, %c0_4, %c0_5] : memref<2x36x256xf32, #tpu.memory_space<vmem>>, vector<1x36x256xf32>
    %3 = vector.shape_cast %2 : vector<1x36x256xf32> to vector<36x256xf32>
    %cst = arith.constant dense<0.000000e+00> : vector<8x256xf32>
    %4 = tpu.matmul %0, %3, %cst {dimension_numbers = #tpu.dot_dimension_numbers<[1], [0], [0], [1], [0, 0, 1, 1], [], []>} : vector<8x36xf32>, vector<36x256xf32>, vector<8x256xf32> -> vector<8x256xf32>
    %5 = vector.broadcast %1 : vector<8x1xf32> to vector<8x256xf32>
    %6 = arith.addf %4, %5 : vector<8x256xf32>
    %cst_6 = arith.constant 0.000000e+00 : f32
    %7 = vector.broadcast %cst_6 : f32 to vector<8x256xf32>
    %8 = arith.maximumf %6, %7 : vector<8x256xf32>
    %c0_7 = arith.constant 0 : index
    %c0_8 = arith.constant 0 : index
    %c0_9 = arith.constant 0 : index
    %9 = vector.load %arg4[%c0_7, %c0_8, %c0_9] : memref<2x8x256xf32, #tpu.memory_space<vmem>>, vector<1x8x256xf32>
    %10 = vector.shape_cast %9 : vector<1x8x256xf32> to vector<8x256xf32>
    %11 = vector.shape_cast %8 : vector<8x256xf32> to vector<1x8x256xf32>
    tpu.vector_store %arg4[%c0_7, %c0_8, %c0_9], %11 {strides = array<i32>} : memref<2x8x256xf32, #tpu.memory_space<vmem>>, vector<1x8x256xf32>,
    %c1 = arith.constant 1 : index
    %c0_10 = arith.constant 0 : index
    %c0_11 = arith.constant 0 : index
    %12 = vector.load %arg1[%c1, %c0_10, %c0_11] : memref<2x36x256xf32, #tpu.memory_space<vmem>>, vector<1x36x256xf32>
    %13 = vector.shape_cast %12 : vector<1x36x256xf32> to vector<36x256xf32>
    %cst_12 = arith.constant dense<0.000000e+00> : vector<8x256xf32>
    %14 = tpu.matmul %0, %13, %cst_12 {dimension_numbers = #tpu.dot_dimension_numbers<[1], [0], [0], [1], [0, 0, 1, 1], [], []>} : vector<8x36xf32>, vector<36x256xf32>, vector<8x256xf32> -> vector<8x256xf32>
    %15 = vector.broadcast %1 : vector<8x1xf32> to vector<8x256xf32>
    %16 = arith.addf %14, %15 : vector<8x256xf32>
    %cst_13 = arith.constant 0.000000e+00 : f32
    %17 = vector.broadcast %cst_13 : f32 to vector<8x256xf32>
    %18 = arith.maximumf %16, %17 : vector<8x256xf32>
    %c1_14 = arith.constant 1 : index
    %c0_15 = arith.constant 0 : index
    %c0_16 = arith.constant 0 : index
    %19 = vector.load %arg4[%c1_14, %c0_15, %c0_16] : memref<2x8x256xf32, #tpu.memory_space<vmem>>, vector<1x8x256xf32>
    %20 = vector.shape_cast %19 : vector<1x8x256xf32> to vector<8x256xf32>
    %21 = vector.shape_cast %18 : vector<8x256xf32> to vector<1x8x256xf32>
    tpu.vector_store %arg4[%c1_14, %c0_15, %c0_16], %21 {strides = array<i32>} : memref<2x8x256xf32, #tpu.memory_space<vmem>>, vector<1x8x256xf32>,
    return
  }
  func.func @transform_0(%arg0: i32) -> (i32, i32, i32) {
    %c0_i32 = arith.constant 0 : i32
    %c0_i32_0 = arith.constant 0 : i32
    %c0_i32_1 = arith.constant 0 : i32
    return %arg0, %c0_i32, %c0_i32_0 : i32, i32, i32
  }
  func.func @transform_1(%arg0: i32) -> (i32, i32) {
    %c0_i32 = arith.constant 0 : i32
    %c0_i32_0 = arith.constant 0 : i32
    %c0_i32_1 = arith.constant 0 : i32
    return %c0_i32, %c0_i32_0 : i32, i32
  }
  func.func @transform_2(%arg0: i32) -> (i32, i32) {
    %c0_i32 = arith.constant 0 : i32
    %c0_i32_0 = arith.constant 0 : i32
    %c0_i32_1 = arith.constant 0 : i32
    return %c0_i32, %c0_i32_0 : i32, i32
  }
  func.func @transform_3(%arg0: i32) -> (i32, i32, i32) {
    %c0_i32 = arith.constant 0 : i32
    %c0_i32_0 = arith.constant 0 : i32
    %c0_i32_1 = arith.constant 0 : i32
    return %arg0, %c0_i32, %c0_i32_0 : i32, i32, i32
  }
}

</mosaic_0001>

<bundles_post_ra>
// kernel: tpu_custom_call.1
= control target key start
LH: loop header
LB: loop body
LE: loop exit
PB: predicated region body
PF: predicated region fallthrough
CT: control target
= control target key end

     0   :  { %vm36_vm0 = vcmask 1043456   ;;  %v216_v8 = vmov 0   ;;  %vm32_vm1 = vcmask 293888   ;;  %s317_s0 = inlined_call_operand.vmem [shape: f32[2,36,256], index: 0, kind: input, shape index: {}]   ;;  %s318_s1 = inlined_call_operand.vmem [shape: f32[8,36], index: 1, kind: input, shape index: {}]   ;;  %s319_s2 = inlined_call_operand.vmem [shape: f32[8,1], index: 2, kind: input, shape index: {}]   ;;  %s320_s3 = inlined_call_operand.hbm [shape: f32[2,8,256], index: 3, kind: output, shape index: {}]  }
   0x1   :  { %v179_v0 = vld [vmem:[%s317_s0 + $0x90] sm:$0xf]  ;;  %v180_v1 = vld [vmem:[%s317_s0 + $0x98] sm:$0xf]  ;;  %v177_v2 = vld [vmem:[%s317_s0 + $0x80] sm:$0xff]  ;;  %189 = vset.pattern.permute.xlu0 %v216_v8 }
   0x2   :  { %181 = vmatpush.msk.msra.mxu2 %vm36_vm0, %v179_v0  ;;  %183 = vmatpush.msk.msra.mxu3 %vm36_vm0, %v180_v1  ;;  %v178_v3 = vld [vmem:[%s317_s0 + $0x88] sm:$0xff]  ;;  %v175_v4 = vld [vmem:[%s317_s0 + $0x70] sm:$0xff]  ;;  %v176_v5 = vld [vmem:[%s317_s0 + $0x78] sm:$0xff] }
   0x3   :  { %v25_v6 = vld [vmem:[%s317_s0 + $0x40] sm:$0xf]  ;;  %v26_v7 = vld [vmem:[%s317_s0 + $0x48] sm:$0xf]  ;;  %v23_v9 = vld [vmem:[%s317_s0 + $0x30] sm:$0xff] }
   0x4   :  { %116 = vmatpush.msra.mxu2 %v177_v2  ;;  %136 = vmatpush.msra.mxu3 %v178_v3  ;;  %v24_v10 = vld [vmem:[%s317_s0 + $0x38] sm:$0xff]  ;;  %v173_v11 = vld [vmem:[%s317_s0 + $0x60] sm:$0xff]  ;;  %v174_v12 = vld [vmem:[%s317_s0 + $0x68] sm:$0xff] }
   0x5   :  { %167 = vmatpush.msk.msra.mxu0 %vm36_vm0, %v25_v6  ;;  %169 = vmatpush.msk.msra.mxu1 %vm36_vm0, %v26_v7  ;;  %v21_v13 = vld [vmem:[%s317_s0 + $0x20] sm:$0xff]  ;;  %v22_v14 = vld [vmem:[%s317_s0 + $0x28] sm:$0xff]  ;;  %v171_v15 = vld [vmem:[%s317_s0 + $0x50] sm:$0xff] }
   0x6   :  { %117 = vmatpush.msra.mxu2 %v175_v4  ;;  %137 = vmatpush.msra.mxu3 %v176_v5  ;;  %v172_v16 = vld [vmem:[%s317_s0 + $0x58] sm:$0xff]  ;;  %v15_v17 = vld [vmem:[%s318_s1] sm:$0xff] }
   0x7   :  { %55 = vmatpush.msra.mxu0 %v23_v9  ;;  %75 = vmatpush.msra.mxu1 %v24_v10 }
   0x8   :  { %118 = vmatpush.msra.mxu2 %v173_v11  ;;  %138 = vmatpush.msra.mxu3 %v174_v12 }
   0x9   :  { %8 = vsyncpa [#allocation3], 0  ;;  %56 = vmatpush.msra.mxu0 %v21_v13  ;;  %76 = vmatpush.msra.mxu1 %v22_v14  ;;  %v19_v18 = vld [vmem:[%s317_s0 + $0x10] sm:$0xff]  ;;  %v20_v19 = vld [vmem:[%s317_s0 + $0x18] sm:$0xff]  ;;  %s155_s30 = sshll.u32 %s320_s3, 4  ;;  %s218_s4 = smov 256   ;;  %s156_s30 = int_to_ptr.hbm [resolvable:$true] %s155_s30 }
   0xa   :  { %119 = vmatpush.msra.mxu2 %v171_v15  ;;  %139 = vmatpush.msra.mxu3 %v172_v16  ;;  %v16_v20 = vld [vmem:[%s319_s2] sm:$0xff]  ;;  %v18_v22 = vld [vmem:[%s317_s0 + $0x8] sm:$0xff]  ;;  %s217_s2 = smov [#allocation2]   ;;  %s219_s5 = smov 16  }
   0xb   :  { %182 = vmatmul.msk.f32.vlgmr.msra.gmra.mxu2 %vm32_vm1, %v15_v17  ;;  %184 = vmatmul.msk.f32.vlgmr.msra.gmra.mxu3 %vm32_vm1, %v15_v17  ;;  %v17_v21 = vld [vmem:[%s317_s0] sm:$0xff]  ;;  %s153_s28 = sshll.u32 %s217_s2, 4  ;;  %s154_s28 = int_to_ptr.vmem [resolvable:$true] %s153_s28 }
   0xc   :  { %57 = vmatpush.msra.mxu0 %v19_v18  ;;  %77 = vmatpush.msra.mxu1 %v20_v19 }
   0xd   :  { %29 = vperm.xlu0 %189, %v16_v20  }
   0xe   :  { %58 = vmatpush.msra.mxu0 %v17_v21  ;;  %78 = vmatpush.msra.mxu1 %v18_v22 }
   0xf   :  { %168 = vmatmul.msk.f32.vlgmr.msra.gmra.mxu0 %vm32_vm1, %v15_v17  ;;  %170 = vmatmul.msk.f32.vlgmr.msra.gmra.mxu1 %vm32_vm1, %v15_v17 }
  0x7f   :  { %v30_v23 = vpop.permute.xlu0 %29 }
  0x8c   :  { %v60_v24 = vpop.f32.mrf.mxu0  ;;  %v80_v25 = vpop.f32.mrf.mxu1 }
  0x8d   :  { %v61_v26 = vadd.f32 %v60_v24, %v30_v23  ;;  %v81_v27 = vadd.f32 %v80_v25, %v30_v23 }
  0x8e   :  { %v121_v28 = vpop.f32.mrf.mxu2  ;;  %v141_v29 = vpop.f32.mrf.mxu3 }
  0x8f   :  { %v83_v30 = vmax.f32 %v61_v26, 0.0  ;;  %v84_v31 = vmax.f32 %v81_v27, 0.0  ;;  %v122_v32 = vadd.f32 %v121_v28, %v30_v23  ;;  %v142_v33 = vadd.f32 %v141_v29, %v30_v23 }
  0x91   :  { %85 = vst [vmem:[#allocation2] sm:$0xff] %v83_v30  ;;  %v144_v34 = vmax.f32 %v122_v32, 0.0  ;;  %v145_v35 = vmax.f32 %v142_v33, 0.0 }
  0x92   :  { %86 = vst [vmem:[#allocation2 + $0x8] sm:$0xff] %v84_v31 }
  0x93   :  { %147 = vst [vmem:[#allocation2 + $0x10] sm:$0xff] %v144_v34 }
  0x94   :  { %148 = vst [vmem:[#allocation2 + $0x18] sm:$0xff] %v145_v35 }
  0x95   :  { %161 = dma.vmem_to_hbm [thread:$0]  %s154_s28, 512, %s156_s30, [#allocation3], %s218_s4, %s218_s4, %s219_s5  }
  0x96   :  { %214 = dma.done.wait [#allocation3], 512  }
  0x97   :  { %215 = vsyncadd [#allocation3], 4294966784 }
  0x98   :  { %166 = vsyncpa [#allocation3], 1 }

</bundles_post_ra>
